<compile_context>
chip_gen: v5e
topology: v5e:2x2
jax: 0.10.0
libtpu: 0.0.40
codegen_flags: <defaults>
</compile_context>

<pallas_src>
import jax
import jax.numpy as jnp
from jax.experimental import pallas as pl
from jax.experimental.pallas import tpu as pltpu

HIDDEN = 128
LANE = 128


def _round_up(n, m):
    return ((n + m - 1) // m) * m


def _dqn_kernel(x_ref, w1_ref, b1_ref, w2_ref, b2_ref, w3_ref, b3_ref, o_ref):
    # Cast activations to bf16 in-kernel (cheap VPU op, overlapped with DMA).
    x_bf = x_ref[...].astype(jnp.bfloat16)

    # Layer 1: (TB, D_in) @ (D_in, 128) -> f32 acc, + bias, ReLU (all f32)
    h1 = jnp.dot(x_bf, w1_ref[...], preferred_element_type=jnp.float32)
    h1 = jnp.maximum(h1 + b1_ref[...], 0.0)

    # Layer 2: (TB, 128) @ (128, 128) — feed the MXU bf16, accumulate f32
    h2 = jnp.dot(h1.astype(jnp.bfloat16), w2_ref[...],
                 preferred_element_type=jnp.float32)
    h2 = jnp.maximum(h2 + b2_ref[...], 0.0)

    # Layer 3: (TB, 128) @ (128, N_pad) — lane-dense (128-padded) output slab
    out = jnp.dot(h2.astype(jnp.bfloat16), w3_ref[...],
                  preferred_element_type=jnp.float32)
    o_ref[...] = (out + b3_ref[...]).astype(o_ref.dtype)


def dqn_forward(x, params, max_tile_b=1024):
    """Fused MLP forward. x: (B, input_dim) float32. Returns (B, d_out) f32."""
    w1, b1, w2, b2, w3, b3 = params
    B, d_in = x.shape
    d_out = w3.shape[1]

    # Lane-dense output: zero-pad last layer to a multiple of 128 columns so
    # the final store is an unmasked slab; wrapper slices back to (B, d_out).
    n_pad = max(LANE, _round_up(d_out, LANE))
    if n_pad != d_out:
        w3 = jnp.pad(w3, ((0, 0), (0, n_pad - d_out)))
        b3 = jnp.pad(b3, ((0, 0), (0, n_pad - d_out)))

    # Batch tiling (TILE_B multiple of 8, capped so the same tiling has VMEM
    # headroom on v7x's 64 MiB physical / 32 MiB scoped VMEM).
    tile_b = min(max_tile_b, _round_up(B, 8))
    b_pad = _round_up(B, tile_b)
    if b_pad != B:
        x = jnp.pad(x, ((0, b_pad - B), (0, 0)))

    # bf16 weights for native-rate MXU; biases stay f32 (added post-matmul).
    w1_bf = w1.astype(jnp.bfloat16)
    w2_bf = w2.astype(jnp.bfloat16)
    w3_bf = w3.astype(jnp.bfloat16)
    b1_f = b1.astype(jnp.float32)
    b2_f = b2.astype(jnp.float32)
    b3_f = b3.astype(jnp.float32)

    grid = (b_pad // tile_b,)
    # Weights/biases: constant block index -> stay resident in VMEM, no re-DMA.
    resident = lambda shape: pl.BlockSpec(shape, lambda i: (0, 0))

    flops = 2 * b_pad * (d_in * HIDDEN + HIDDEN * HIDDEN + HIDDEN * n_pad)
    bytes_accessed = (
        x.size * 4                                             # f32 activations in
        + (w1_bf.size + w2_bf.size + w3_bf.size) * 2           # bf16 weights
        + (b1_f.size + b2_f.size + b3_f.size) * 4              # f32 biases
        + b_pad * n_pad * 4                                    # f32 output
    )

    out_padded = pl.pallas_call(
        _dqn_kernel,
        out_shape=jax.ShapeDtypeStruct((b_pad, n_pad), jnp.float32),
        grid=grid,
        in_specs=[
            pl.BlockSpec((tile_b, d_in), lambda i: (i, 0)),     # x: tiled on batch
            resident((d_in, HIDDEN)), resident((1, HIDDEN)),    # W1, b1 (resident)
            resident((HIDDEN, HIDDEN)), resident((1, HIDDEN)),  # W2, b2
            resident((HIDDEN, n_pad)), resident((1, n_pad)),    # W3, b3 (padded)
        ],
        out_specs=pl.BlockSpec((tile_b, n_pad), lambda i: (i, 0)),
        compiler_params=pltpu.CompilerParams(
            dimension_semantics=("parallel",),          # megacore shard on v7x
            vmem_limit_bytes=32 * 1024 * 1024,          # safe on v7x's 64 MiB VMEM
        ),
        cost_estimate=pl.CostEstimate(
            flops=flops, transcendentals=0, bytes_accessed=bytes_accessed),
    )(x, w1_bf, b1_f, w2_bf, b2_f, w3_bf, b3_f)

    return out_padded[:B, :d_out]


def init_dqn_params(key, input_dim, output_dim, hidden=HIDDEN):
    """Deterministic init mimicking PyTorch nn.Linear defaults
    (uniform(-1/sqrt(fan_in), 1/sqrt(fan_in)))."""
    keys = jax.random.split(key, 6)

    def linear(kw, kb, fan_in, fan_out):
        bound = 1.0 / jnp.sqrt(jnp.float32(fan_in))
        w = jax.random.uniform(kw, (fan_in, fan_out), jnp.float32, -bound, bound)
        b = jax.random.uniform(kb, (1, fan_out), jnp.float32, -bound, bound)
        return w, b

    w1, b1 = linear(keys[0], keys[1], input_dim, hidden)
    w2, b2 = linear(keys[2], keys[3], hidden, hidden)
    w3, b3 = linear(keys[4], keys[5], hidden, output_dim)
    return (w1, b1, w2, b2, w3, b3)


def dqn_reference(x, params):
    """Plain-JAX f32 reference matching PyTorch semantics."""
    w1, b1, w2, b2, w3, b3 = params
    h = jnp.maximum(x @ w1 + b1, 0.0)
    h = jnp.maximum(h @ w2 + b2, 0.0)
    return h @ w3 + b3


if __name__ == "__main__":
    key = jax.random.PRNGKey(0)
    k_param, k_x = jax.random.split(key)

    batch = 8
    input_dim = 32     # state-vector dimension
    output_dim = 8     # number of discrete actions

    params = init_dqn_params(k_param, input_dim, output_dim)
    x = jax.random.normal(k_x, (batch, input_dim), dtype=jnp.float32)

    # TODO(synk): for the deployed acting/training loop, fuse argmax / TD-target
    # max into this kernel and batch states to B>=256 to amortize launch cost.
    fwd = jax.jit(lambda xx: dqn_forward(xx, params))
    out = jax.block_until_ready(fwd(x))

    ref = dqn_reference(x, params)
    assert out.shape == (batch, output_dim)
    # bf16 weights/activations on the MXU => loosened tolerance vs. f32 ref.
    assert jnp.allclose(out, ref, atol=5e-2, rtol=5e-2), "mismatch vs reference"

    print("KERNEL_OK")
</pallas_src>

<mosaic_0001>
module attributes {stable_mosaic.version = 11 : i64} {
  func.func @_dqn_kernel(%arg0: i32, %arg1: memref<8x32xf32, #tpu.memory_space<vmem>>, %arg2: memref<32x128xbf16, #tpu.memory_space<vmem>>, %arg3: memref<1x128xf32, #tpu.memory_space<vmem>>, %arg4: memref<128x128xbf16, #tpu.memory_space<vmem>>, %arg5: memref<1x128xf32, #tpu.memory_space<vmem>>, %arg6: memref<128x128xbf16, #tpu.memory_space<vmem>>, %arg7: memref<1x128xf32, #tpu.memory_space<vmem>>, %arg8: memref<8x128xf32, #tpu.memory_space<vmem>>) attributes {dimension_semantics = [#tpu.dimension_semantics<parallel>], iteration_bounds = array<i64: 1>, scalar_prefetch = 0 : i64, scratch_operands = 0 : i64, tpu.core_type = #tpu.core_type<tc>, window_params = [{transform_indices = @transform_0, window_bounds = array<i64: 8, 32>}, {pipeline_mode = #tpu.pipeline_mode<synchronous>, transform_indices = @transform_1, window_bounds = array<i64: 32, 128>}, {pipeline_mode = #tpu.pipeline_mode<synchronous>, transform_indices = @transform_2, window_bounds = array<i64: 1, 128>}, {pipeline_mode = #tpu.pipeline_mode<synchronous>, transform_indices = @transform_3, window_bounds = array<i64: 128, 128>}, {pipeline_mode = #tpu.pipeline_mode<synchronous>, transform_indices = @transform_4, window_bounds = array<i64: 1, 128>}, {pipeline_mode = #tpu.pipeline_mode<synchronous>, transform_indices = @transform_5, window_bounds = array<i64: 128, 128>}, {pipeline_mode = #tpu.pipeline_mode<synchronous>, transform_indices = @transform_6, window_bounds = array<i64: 1, 128>}, {transform_indices = @transform_7, window_bounds = array<i64: 8, 128>}]} {
    %c0 = arith.constant 0 : index
    %c0_0 = arith.constant 0 : index
    %0 = vector.load %arg1[%c0, %c0_0] : memref<8x32xf32, #tpu.memory_space<vmem>>, vector<8x32xf32>
    %1 = arith.truncf %0 : vector<8x32xf32> to vector<8x32xbf16>
    %c0_1 = arith.constant 0 : index
    %c0_2 = arith.constant 0 : index
    %2 = vector.load %arg2[%c0_1, %c0_2] : memref<32x128xbf16, #tpu.memory_space<vmem>>, vector<32x128xbf16>
    %cst = arith.constant dense<0.000000e+00> : vector<8x128xf32>
    %3 = tpu.matmul %1, %2, %cst {dimension_numbers = #tpu.dot_dimension_numbers<[1], [0], [0], [1], [0, 0, 1, 1], [], []>} : vector<8x32xbf16>, vector<32x128xbf16>, vector<8x128xf32> -> vector<8x128xf32>
    %c0_3 = arith.constant 0 : index
    %c0_4 = arith.constant 0 : index
    %4 = vector.load %arg3[%c0_3, %c0_4] : memref<1x128xf32, #tpu.memory_space<vmem>>, vector<1x128xf32>
    %5 = vector.broadcast %4 : vector<1x128xf32> to vector<8x128xf32>
    %6 = arith.addf %3, %5 : vector<8x128xf32>
    %cst_5 = arith.constant 0.000000e+00 : f32
    %7 = vector.broadcast %cst_5 : f32 to vector<8x128xf32>
    %8 = arith.maximumf %6, %7 : vector<8x128xf32>
    %9 = arith.truncf %8 : vector<8x128xf32> to vector<8x128xbf16>
    %c0_6 = arith.constant 0 : index
    %c0_7 = arith.constant 0 : index
    %10 = vector.load %arg4[%c0_6, %c0_7] : memref<128x128xbf16, #tpu.memory_space<vmem>>, vector<128x128xbf16>
    %cst_8 = arith.constant dense<0.000000e+00> : vector<8x128xf32>
    %11 = tpu.matmul %9, %10, %cst_8 {dimension_numbers = #tpu.dot_dimension_numbers<[1], [0], [0], [1], [0, 0, 1, 1], [], []>} : vector<8x128xbf16>, vector<128x128xbf16>, vector<8x128xf32> -> vector<8x128xf32>
    %c0_9 = arith.constant 0 : index
    %c0_10 = arith.constant 0 : index
    %12 = vector.load %arg5[%c0_9, %c0_10] : memref<1x128xf32, #tpu.memory_space<vmem>>, vector<1x128xf32>
    %13 = vector.broadcast %12 : vector<1x128xf32> to vector<8x128xf32>
    %14 = arith.addf %11, %13 : vector<8x128xf32>
    %cst_11 = arith.constant 0.000000e+00 : f32
    %15 = vector.broadcast %cst_11 : f32 to vector<8x128xf32>
    %16 = arith.maximumf %14, %15 : vector<8x128xf32>
    %17 = arith.truncf %16 : vector<8x128xf32> to vector<8x128xbf16>
    %c0_12 = arith.constant 0 : index
    %c0_13 = arith.constant 0 : index
    %18 = vector.load %arg6[%c0_12, %c0_13] : memref<128x128xbf16, #tpu.memory_space<vmem>>, vector<128x128xbf16>
    %cst_14 = arith.constant dense<0.000000e+00> : vector<8x128xf32>
    %19 = tpu.matmul %17, %18, %cst_14 {dimension_numbers = #tpu.dot_dimension_numbers<[1], [0], [0], [1], [0, 0, 1, 1], [], []>} : vector<8x128xbf16>, vector<128x128xbf16>, vector<8x128xf32> -> vector<8x128xf32>
    %c0_15 = arith.constant 0 : index
    %c0_16 = arith.constant 0 : index
    %20 = vector.load %arg7[%c0_15, %c0_16] : memref<1x128xf32, #tpu.memory_space<vmem>>, vector<1x128xf32>
    %21 = vector.broadcast %20 : vector<1x128xf32> to vector<8x128xf32>
    %22 = arith.addf %19, %21 : vector<8x128xf32>
    %c0_17 = arith.constant 0 : index
    %c0_18 = arith.constant 0 : index
    %23 = vector.load %arg8[%c0_17, %c0_18] : memref<8x128xf32, #tpu.memory_space<vmem>>, vector<8x128xf32>
    tpu.vector_store %arg8[%c0_17, %c0_18], %22 {strides = array<i32>} : memref<8x128xf32, #tpu.memory_space<vmem>>, vector<8x128xf32>,
    return
  }
  func.func @transform_0(%arg0: i32) -> (i32, i32) {
    %c0_i32 = arith.constant 0 : i32
    %c0_i32_0 = arith.constant 0 : i32
    return %arg0, %c0_i32 : i32, i32
  }
  func.func @transform_1(%arg0: i32) -> (i32, i32) {
    %c0_i32 = arith.constant 0 : i32
    %c0_i32_0 = arith.constant 0 : i32
    %c0_i32_1 = arith.constant 0 : i32
    return %c0_i32, %c0_i32_0 : i32, i32
  }
  func.func @transform_2(%arg0: i32) -> (i32, i32) {
    %c0_i32 = arith.constant 0 : i32
    %c0_i32_0 = arith.constant 0 : i32
    %c0_i32_1 = arith.constant 0 : i32
    return %c0_i32, %c0_i32_0 : i32, i32
  }
  func.func @transform_3(%arg0: i32) -> (i32, i32) {
    %c0_i32 = arith.constant 0 : i32
    %c0_i32_0 = arith.constant 0 : i32
    %c0_i32_1 = arith.constant 0 : i32
    return %c0_i32, %c0_i32_0 : i32, i32
  }
  func.func @transform_4(%arg0: i32) -> (i32, i32) {
    %c0_i32 = arith.constant 0 : i32
    %c0_i32_0 = arith.constant 0 : i32
    %c0_i32_1 = arith.constant 0 : i32
    return %c0_i32, %c0_i32_0 : i32, i32
  }
  func.func @transform_5(%arg0: i32) -> (i32, i32) {
    %c0_i32 = arith.constant 0 : i32
    %c0_i32_0 = arith.constant 0 : i32
    %c0_i32_1 = arith.constant 0 : i32
    return %c0_i32, %c0_i32_0 : i32, i32
  }
  func.func @transform_6(%arg0: i32) -> (i32, i32) {
    %c0_i32 = arith.constant 0 : i32
    %c0_i32_0 = arith.constant 0 : i32
    %c0_i32_1 = arith.constant 0 : i32
    return %c0_i32, %c0_i32_0 : i32, i32
  }
  func.func @transform_7(%arg0: i32) -> (i32, i32) {
    %c0_i32 = arith.constant 0 : i32
    %c0_i32_0 = arith.constant 0 : i32
    return %arg0, %c0_i32 : i32, i32
  }
}

</mosaic_0001>

<bundles_post_ra>
// kernel: _lambda_.1
= control target key start
LH: loop header
LB: loop body
LE: loop exit
PB: predicated region body
PF: predicated region fallthrough
CT: control target
= control target key end

     0   :  { %12 = vsyncpa [#allocation3], 0  ;;  %s653_s0 = inlined_call_operand.hbm [shape: f32[8,32], index: 0, kind: input, shape index: {}]   ;;  %s654_s1 = inlined_call_operand.hbm [shape: bf16[32,128], index: 1, kind: input, shape index: {}]   ;;  %s655_s2 = inlined_call_operand.hbm [shape: f32[1,128], index: 2, kind: input, shape index: {}]   ;;  %s656_s3 = inlined_call_operand.hbm [shape: bf16[128,128], index: 3, kind: input, shape index: {}]   ;;  %s657_s4 = inlined_call_operand.vmem [shape: f32[1,128], index: 4, kind: input, shape index: {}]   ;;  %s658_s5 = inlined_call_operand.hbm [shape: bf16[128,128], index: 5, kind: input, shape index: {}]   ;;  %s659_s6 = inlined_call_operand.vmem [shape: f32[1,128], index: 6, kind: input, shape index: {}]   ;;  %s660_s7 = inlined_call_operand.hbm [shape: f32[8,128], index: 7, kind: output, shape index: {}]  }
   0x1   :  { %13 = vsyncpa [#allocation6], 0 }
   0x2   :  { %14 = vsyncpa [#allocation9], 0  ;;  %s31_s26 = sshll.u32 %s654_s1, 4  ;;  %s32_s26 = int_to_ptr.hbm [resolvable:$true] %s31_s26 }
   0x3   :  { %15 = vsyncpa [#allocation4], 0  ;;  %s581_s27 = smov [#allocation5]   ;;  %s55_s8 = sshll.u32 %s656_s3, 4  ;;  %s56_s8 = int_to_ptr.hbm [resolvable:$true] %s55_s8 }
   0x4   :  { %s33_s28 = sshll.u32 %s581_s27, 4  ;;  %s582_s9 = smov 64   ;;  %s34_s28 = int_to_ptr.vmem [resolvable:$true] %s33_s28 }
   0x5   :  { %s583_s10 = smov 4   ;;  %s584_s11 = smov [#allocation8]  }
   0x6   :  { %39 = dma.hbm_to_vmem [thread:$0]  %s32_s26, 256, %s34_s28, [#allocation6], %s582_s9, %s582_s9, %s583_s10  }
   0x7   :  { %s57_s12 = sshll.u32 %s584_s11, 4  ;;  %s21_s15 = sshll.u32 %s653_s0, 4  ;;  %s58_s12 = int_to_ptr.vmem [resolvable:$true] %s57_s12  ;;  %s22_s15 = int_to_ptr.hbm [resolvable:$true] %s21_s15 }
   0x8   :  { %63 = dma.hbm_to_vmem [thread:$0]  %s56_s8, 1024, %s58_s12, [#allocation9], %s582_s9, %s582_s9, %s583_s10  }
   0x9   :  { %s45_s17 = sshll.u32 %s655_s2, 4  ;;  %s585_s18 = smov [#allocation2]   ;;  %s46_s17 = int_to_ptr.hbm [resolvable:$true] %s45_s17 }
   0xa   :  { %s23_s19 = sshll.u32 %s585_s18, 4  ;;  %s586_s3 = smov [#allocation7]   ;;  %s24_s19 = int_to_ptr.vmem [resolvable:$true] %s23_s19 }
   0xb   :  { %26 = dma.hbm_to_vmem [thread:$0]  %s22_s15, 128, %s24_s19, [#allocation3]  }
   0xc   :  { %s47_s20 = sshll.u32 %s586_s3, 4  ;;  %s70_s23 = sshll.u32 %s658_s5, 4  ;;  %s48_s20 = int_to_ptr.vmem [resolvable:$true] %s47_s20  ;;  %s71_s23 = int_to_ptr.hbm [resolvable:$true] %s70_s23 }
   0xd   :  { %50 = dma.hbm_to_vmem [thread:$0]  %s46_s17, 16, %s48_s20, [#allocation6]  }
   0xe   :  { %s587_s0 = smov [#allocation10]  }
   0xf   :  { %s72_s24 = sshll.u32 %s587_s0, 4  ;;  %s73_s24 = int_to_ptr.vmem [resolvable:$true] %s72_s24 }
  0x10   :  { %78 = dma.hbm_to_vmem [thread:$0]  %s71_s23, 1024, %s73_s24, [#allocation9], %s582_s9, %s582_s9, %s583_s10  }
  0x11   :  { %573 = dma.done.wait [#allocation3], 128  }
  0x12   :  { %574 = vsyncadd [#allocation3], 4294967168 }
  0x13   :  { %575 = dma.done.wait [#allocation6], 272  }
  0x14   :  { %576 = vsyncadd [#allocation6], 4294967024 }
  0x15   :  { %577 = dma.done.wait [#allocation9], 2048  }
  0x16   :  { %578 = vsyncadd [#allocation9], 4294965248  ;;  %v401_v0 = vld [vmem:[#allocation5 + $0x8] sm:$0xff]  ;;  %v400_v2 = vld [vmem:[#allocation5] sm:$0xff]  ;;  %vm124_vm0 = vcmask 261120   ;;  %s588_s27 = smov [#allocation11]  }
  0x17   :  { %v409_v1 = vld [vmem:[#allocation8 + $0x38] sm:$0xff]  ;;  %134 = vmatpush.bf16.msra.mxu0 %v401_v0  ;;  %v102_v3 = vld [vmem:[#allocation2] sm:$0xff]  ;;  %v408_v4 = vld [vmem:[#allocation8 + $0x30] sm:$0xff]  ;;  %s313_s28 = sshll.u32 %s588_s27, 4  ;;  %s315_s8 = sshll.u32 %s660_s7, 4  ;;  %s314_s28 = int_to_ptr.vmem [resolvable:$true] %s313_s28  ;;  %s316_s8 = int_to_ptr.hbm [resolvable:$true] %s315_s8 }
  0x18   :  { %211 = vmatpush.bf16.msra.mxu1 %v409_v1  ;;  %v103_v5 = vpack.c.bf16 %v102_v3, %v102_v3  ;;  %v407_v6 = vld [vmem:[#allocation8 + $0x28] sm:$0xff]  ;;  %v406_v7 = vld [vmem:[#allocation8 + $0x20] sm:$0xff]  ;;  %v405_v8 = vld [vmem:[#allocation8 + $0x18] sm:$0xff] }
  0x19   :  { %v404_v9 = vld [vmem:[#allocation8 + $0x10] sm:$0xff]  ;;  %v403_v10 = vld [vmem:[#allocation8 + $0x8] sm:$0xff]  ;;  %v402_v11 = vld [vmem:[#allocation8] sm:$0xff] }
  0x1a   :  { %v417_v12 = vld [vmem:[#allocation10 + $0x38] sm:$0xff]  ;;  %v416_v13 = vld [vmem:[#allocation10 + $0x30] sm:$0xff]  ;;  %v415_v14 = vld [vmem:[#allocation10 + $0x28] sm:$0xff] }
  0x1b   :  { %135 = vmatpush.bf16.msra.mxu0 %v400_v2  ;;  %294 = vmatpush.bf16.msra.mxu2 %v417_v12  ;;  %v414_v15 = vld [vmem:[#allocation10 + $0x20] sm:$0xff]  ;;  %v413_v16 = vld [vmem:[#allocation10 + $0x18] sm:$0xff]  ;;  %v412_v17 = vld [vmem:[#allocation10 + $0x10] sm:$0xff] }
  0x1c   :  { %212 = vmatpush.bf16.msra.mxu1 %v408_v4  ;;  %v426_v18 = vld [vmem:[#allocation7] ss:$0 sm:$0xff]  ;;  %v411_v24 = vld [vmem:[#allocation10 + $0x8] sm:$0xff]  ;;  %v410_v25 = vld [vmem:[#allocation10] sm:$0xff] }
  0x1d   :  { %v427_v26 = vld [vmem:[%s657_s4] ss:$0 sm:$0xff] }
  0x1e   :  { %335 = vmatmul.msk.bf16.vlgmr.msra.gmra.mxu0 %vm124_vm0, %v103_v5  ;;  %v428_v32 = vld [vmem:[%s659_s6] ss:$0 sm:$0xff] }
  0x1f   :  { %295 = vmatpush.bf16.msra.mxu2 %v416_v13 }
  0x20   :  { %213 = vmatpush.bf16.msra.mxu1 %v407_v6 }
  0x23   :  { %296 = vmatpush.bf16.msra.mxu2 %v415_v14 }
  0x24   :  { %214 = vmatpush.bf16.msra.mxu1 %v406_v7 }
  0x27   :  { %297 = vmatpush.bf16.msra.mxu2 %v414_v15 }
  0x28   :  { %215 = vmatpush.bf16.msra.mxu1 %v405_v8 }
  0x2b   :  { %298 = vmatpush.bf16.msra.mxu2 %v413_v16 }
  0x2c   :  { %216 = vmatpush.bf16.msra.mxu1 %v404_v9 }
  0x2f   :  { %299 = vmatpush.bf16.msra.mxu2 %v412_v17 }
  0x30   :  { %217 = vmatpush.bf16.msra.mxu1 %v403_v10 }
  0x33   :  { %300 = vmatpush.bf16.msra.mxu2 %v411_v24 }
  0x34   :  { %218 = vmatpush.bf16.msra.mxu1 %v402_v11 }
  0x37   :  { %301 = vmatpush.bf16.msra.mxu2 %v410_v25 }
  0x9b   :  { %v137_v19 = vpop.f32.mrf.mxu0 }
  0x9c   :  { %v138_v20 = vadd.f32 %v426_v18, %v137_v19 }
  0x9e   :  { %v141_v21 = vmax.f32 %v138_v20, 0.0 }
  0xa0   :  { %v142_v22 = vpack.c.bf16 %v141_v21, %v141_v21 }
  0xa2   :  { %219 = vmatmul.bf16.vlgmr.msra.gmra.mxu1 %v142_v22 }
  0xa3   :  { %v139_v23 = vpop.f32.mrf.mxu0 }
 0x11f   :  { %v220_v27 = vpop.f32.mrf.mxu1 }
 0x120   :  { %v221_v28 = vadd.f32 %v427_v26, %v220_v27 }
 0x122   :  { %v224_v29 = vmax.f32 %v221_v28, 0.0 }
 0x124   :  { %v225_v30 = vpack.c.bf16 %v224_v29, %v224_v29 }
 0x126   :  { %302 = vmatmul.bf16.vlgmr.msra.gmra.mxu2 %v225_v30 }
 0x127   :  { %v222_v31 = vpop.f32.mrf.mxu1 }
 0x1a9   :  { %v303_v33 = vpop.f32.mrf.mxu2 }
 0x1aa   :  { %v304_v34 = vadd.f32 %v428_v32, %v303_v33 }
 0x1ac   :  { %307 = vst [vmem:[#allocation11] sm:$0xff] %v304_v34 }
 0x1ad   :  { %318 = dma.vmem_to_hbm [thread:$0]  %s314_s28, 128, %s316_s8, [#allocation4]  }
 0x1b1   :  { %v305_v35 = vpop.f32.mrf.mxu2 }
 0x1b2   :  { %579 = dma.done.wait [#allocation4], 128  }
 0x1b3   :  { %580 = vsyncadd [#allocation4], 4294967168 }
 0x1b4   :  { %323 = vsyncpa [#allocation3], 1 }
 0x1b5   :  { %324 = vsyncpa [#allocation6], 1 }
 0x1b6   :  { %325 = vsyncpa [#allocation9], 1 }
 0x1b7   :  { %326 = vsyncpa [#allocation4], 1 }

</bundles_post_ra>
